<compile_context>
chip_gen: v7x
topology: tpu7x:2x2x1
jax: 0.10.0
libtpu: 0.0.40
codegen_flags: <defaults>
</compile_context>

<pallas_src>
import jax
import jax.numpy as jnp
from jax.experimental import pallas as pl
from jax.experimental.pallas import tpu as pltpu


_VMEM_LIMIT_BYTES = 32 * 1024 * 1024     # safe on v5e/v6e (128 MiB phys) and v7x (64 MiB phys)
_TILE_BYTES_BUDGET = 4 * 1024 * 1024     # per buffer; 2 arrays x 2 buffers = 16 MiB live


def _sublane_pack(dtype) -> int:
    # Minimum second-to-last-dim tile for this dtype (f32: 8, bf16: 16, int8/fp8: 32).
    return max(8, 32 // jnp.dtype(dtype).itemsize)


def _copy_kernel(emb_ref, out_ref):
    # Pure row-slab copy of the current (tm, embed_dim) tile. No in-kernel slicing.
    out_ref[...] = emb_ref[...]


def _make_slice_kernel(t: int):
    def kernel(emb_ref, out_ref):
        # Fallback path: emb_ref is a sublane-aligned window (>= t rows); copy first t.
        out_ref[...] = emb_ref[pl.ds(0, t), :]
    return kernel


def position_embedding_forward(emb: jax.Array, t: int, *, row_tile: int | None = None) -> jax.Array:
    """Equivalent of PositionEmbedding.forward(t): returns emb[:t, :].

    emb:      (lmax, embed_dim) parameter table.
    t:        static python int, 0 < t <= lmax.
    row_tile: optional override for the row tile size (testing / tuning).
    """
    lmax, embed_dim = emb.shape
    assert 0 < t <= lmax
    itemsize = jnp.dtype(emb.dtype).itemsize
    sublane = _sublane_pack(emb.dtype)

    cost = pl.CostEstimate(
        flops=0,
        transcendentals=0,
        bytes_accessed=2 * t * embed_dim * itemsize,
    )

    if t % sublane == 0:
        # ---- main path: row-tiled, pipelined, megacore-parallel copy -------------
        rows_budget = max(sublane, _TILE_BYTES_BUDGET // (embed_dim * itemsize))
        tm = min(t, 1024, rows_budget)
        if row_tile is not None:
            tm = min(tm, row_tile)
        tm = max(sublane, (tm // sublane) * sublane)
        grid = (pl.cdiv(t, tm),)

        return pl.pallas_call(
            _copy_kernel,
            out_shape=jax.ShapeDtypeStruct((t, embed_dim), emb.dtype),
            grid_spec=pltpu.PrefetchScalarGridSpec(
                num_scalar_prefetch=0,
                grid=grid,
                # Only the first t rows of the table are ever DMA'd.
                in_specs=[pl.BlockSpec((tm, embed_dim), lambda i: (i, 0))],
                out_specs=pl.BlockSpec((tm, embed_dim), lambda i: (i, 0)),
            ),
            compiler_params=pltpu.CompilerParams(
                dimension_semantics=("parallel",),
                vmem_limit_bytes=_VMEM_LIMIT_BYTES,
            ),
            cost_estimate=cost,
        )(emb)

    # ---- fallback: t not sublane-aligned ------------------------------------------
    # Input window = t rounded up to the sublane pack (legal block shape), clamped to
    # lmax (full-dim block is always legal). Output block equals the full output.
    # TODO(synk): for very large unaligned t this single block could exceed VMEM;
    #             production tables use aligned t so the tiled path above is taken.
    t_win = min(((t + sublane - 1) // sublane) * sublane, lmax)
    return pl.pallas_call(
        _make_slice_kernel(t),
        out_shape=jax.ShapeDtypeStruct((t, embed_dim), emb.dtype),
        grid_spec=pltpu.PrefetchScalarGridSpec(
            num_scalar_prefetch=0,
            grid=(1,),
            in_specs=[pl.BlockSpec((t_win, embed_dim), lambda i: (0, 0))],
            out_specs=pl.BlockSpec((t, embed_dim), lambda i: (0, 0)),
        ),
        compiler_params=pltpu.CompilerParams(
            dimension_semantics=("arbitrary",),
            vmem_limit_bytes=_VMEM_LIMIT_BYTES,
        ),
        cost_estimate=cost,
    )(emb)


if __name__ == "__main__":
    key = jax.random.PRNGKey(0)

    # Small config consistent with the module: lmax=16, embed_dim=128.
    lmax, embed_dim = 16, 128
    emb = jax.random.normal(key, (lmax, embed_dim), dtype=jnp.float32)

    # 1) aligned t, single tile.
    t = 8
    out = jax.block_until_ready(position_embedding_forward(emb, t))
    assert out.shape == (t, embed_dim) and out.dtype == emb.dtype
    assert jnp.allclose(out, emb[:t, :])

    # 2) aligned t with a forced small row tile -> multi-step pipelined grid.
    t = 16
    out = jax.block_until_ready(position_embedding_forward(emb, t, row_tile=8))
    assert out.shape == (t, embed_dim)
    assert jnp.allclose(out, emb[:t, :])

    # 3) unaligned t -> fallback path (sublane-padded input window, in-kernel slice).
    t = 5
    out = jax.block_until_ready(position_embedding_forward(emb, t))
    assert out.shape == (t, embed_dim)
    assert jnp.allclose(out, emb[:t, :])

    print("KERNEL_OK")
</pallas_src>

<mosaic_0001>
module attributes {stable_mosaic.version = 11 : i64} {
  func.func @_copy_kernel(%arg0: i32, %arg1: memref<8x128xf32, #tpu.memory_space<vmem>>, %arg2: memref<8x128xf32, #tpu.memory_space<vmem>>) attributes {dimension_semantics = [#tpu.dimension_semantics<parallel>], iteration_bounds = array<i64: 1>, scalar_prefetch = 0 : i64, scratch_operands = 0 : i64, tpu.core_type = #tpu.core_type<tc>, window_params = [{transform_indices = @transform_0, window_bounds = array<i64: 8, 128>}, {transform_indices = @transform_1, window_bounds = array<i64: 8, 128>}]} {
    %c0 = arith.constant 0 : index
    %c0_0 = arith.constant 0 : index
    %0 = vector.load %arg1[%c0, %c0_0] : memref<8x128xf32, #tpu.memory_space<vmem>>, vector<8x128xf32>
    %c0_1 = arith.constant 0 : index
    %c0_2 = arith.constant 0 : index
    %1 = vector.load %arg2[%c0_1, %c0_2] : memref<8x128xf32, #tpu.memory_space<vmem>>, vector<8x128xf32>
    tpu.vector_store %arg2[%c0_1, %c0_2], %0 {strides = array<i32>} : memref<8x128xf32, #tpu.memory_space<vmem>>, vector<8x128xf32>,
    return
  }
  func.func @transform_0(%arg0: i32) -> (i32, i32) {
    %c0_i32 = arith.constant 0 : i32
    %c0_i32_0 = arith.constant 0 : i32
    return %arg0, %c0_i32 : i32, i32
  }
  func.func @transform_1(%arg0: i32) -> (i32, i32) {
    %c0_i32 = arith.constant 0 : i32
    %c0_i32_0 = arith.constant 0 : i32
    return %arg0, %c0_i32 : i32, i32
  }
}

</mosaic_0001>

<bundles_post_ra>
// kernel: tpu_custom_call.1
= control target key start
LH: loop header
LB: loop body
LE: loop exit
PB: predicated region body
PF: predicated region fallthrough
CT: control target
= control target key end

     0   :  { %6 = vsyncpa [#allocation3], 0  ;;  %s127_s0 = inlined_call_operand.hbm [shape: f32[16,128], index: 0, kind: input, shape index: {}]   ;;  %s128_s1 = inlined_call_operand.hbm [shape: f32[8,128], index: 1, kind: output, shape index: {}]  }
   0x1   :  { %7 = vsyncpa [#allocation4], 0  ;;  %s88_s6 = smov [#allocation2]   ;;  %s40_s10 = scalar_lea.hbm %s127_s0, 128 }
   0x2   :  { %s14_s7 = sshll.u32 %s88_s6, 4  ;;  %p41_p0 = scmp.ne.s32.totalorder %s127_s0, %s40_s10  ;;  %s15_s7 = int_to_ptr.vmem [resolvable:$true] %s14_s7 }
   0x3   :  { %s42_s15 = scalar_lea.hbm %s127_s0, 256  ;;  %p44_p2 = scmp.lt.u32.totalorder %s40_s10, %s127_s0 }
   0x4   :  { %p43_p1 = scmp.lt.u32.totalorder %s42_s15, %s40_s10 }
   0x6   :  { %p45_p3 = por %p44_p2, %p43_p1 }
   0x8   :  { %p46_p4 = pnand %p45_p3, %p41_p0 }
   0xa   :  { %49 = shalt.err (!%p46_p4)
}
   0xb   :  { %s50_s18 = scalar_lea.vmem %s15_s7, 128  ;;  %p55_p6 = scmp.lt.s32.totalorder %s15_s7, %s15_s7 }
   0xc   :  { %p51_p5 = scmp.ne.s32.totalorder %s15_s7, %s50_s18  ;;  %p56_p7 = scmp.lt.s32.totalorder %s50_s18, %s50_s18 }
   0xe   :  { %p57_p8 = por %p56_p7, %p55_p6 }
  0x10   :  { %p58_p9 = pnand %p57_p8, %p51_p5 }
  0x12   :  { %61 = shalt.err (!%p58_p9)
}
  0x13   :  { %17 = dma.hbm_to_vmem [thread:$0]  %s127_s0, 128, %s15_s7, [#allocation3]  }
  0x14   :  { %84 = dma.done.wait [#allocation3], 128  }
  0x15   :  { %85 = vsyncadd [#allocation3], 4294967168  ;;  %s89_s21 = smov [#allocation5]   ;;  %v21_v0 = vld [vmem:[#allocation2] sm:$0xff] }
  0x16   :  { %s29_s22 = sshll.u32 %s89_s21, 4  ;;  %22 = vst [vmem:[#allocation5] sm:$0xff] %v21_v0  ;;  %s30_s22 = int_to_ptr.vmem [resolvable:$true] %s29_s22 }
  0x17   :  { %s62_s23 = scalar_lea.vmem %s30_s22, 128  ;;  %p67_p11 = scmp.lt.s32.totalorder %s30_s22, %s30_s22 }
  0x18   :  { %p63_p10 = scmp.ne.s32.totalorder %s30_s22, %s62_s23  ;;  %p68_p12 = scmp.lt.s32.totalorder %s62_s23, %s62_s23 }
  0x1a   :  { %p69_p13 = por %p68_p12, %p67_p11 }
  0x1c   :  { %p70_p0 = pnand %p69_p13, %p63_p10 }
  0x1e   :  { %73 = shalt.err (!%p70_p0)
}
  0x1f   :  { %s74_s26 = scalar_lea.hbm %s128_s1, 128 }
  0x20   :  { %p75_p1 = scmp.ne.s32.totalorder %s128_s1, %s74_s26  ;;  %p78_p2 = scmp.lt.u32.totalorder %s74_s26, %s128_s1 }
  0x22   :  { %p80_p3 = pnand %p78_p2, %p75_p1 }
  0x24   :  { %83 = shalt.err (!%p80_p3)
}
  0x25   :  { %32 = dma.vmem_to_hbm [thread:$0]  %s30_s22, 128, %s128_s1, [#allocation4]  }
  0x26   :  { %86 = dma.done.wait [#allocation4], 128  }
  0x27   :  { %87 = vsyncadd [#allocation4], 4294967168 }
  0x28   :  { %36 = vsyncpa [#allocation3], 1 }
  0x29   :  { %37 = vsyncpa [#allocation4], 1 }

</bundles_post_ra>
